<compile_context>
chip_gen: v7x
topology: tpu7x:2x2x1
jax: 0.10.0
libtpu: 0.0.40
codegen_flags: <defaults>
</compile_context>

<pallas_src>
import jax
import jax.numpy as jnp
from jax import lax
from jax.experimental import pallas as pl
from jax.experimental.pallas import tpu as pltpu


def _round_up(n, m):
    return ((n + m - 1) // m) * m


def _critic_kernel(xa_ref, wcat_ref, w2h_ref, w3_ref, o_ref):
    h1p = w2h_ref.shape[0]  # fc1 width, padded to a multiple of 128

    # One MXU matmul gives the fused pre-activations:
    #   g = [x@W1 + b1 | a@W2a + b2]            (f32 accumulation)
    g = jnp.dot(xa_ref[...], wcat_ref[...], preferred_element_type=jnp.float32)

    # fc1 epilogue (slice is lane-tile aligned: h1p % 128 == 0).
    h1 = jnp.maximum(g[:, :h1p], 0.0).astype(w2h_ref.dtype)

    # fc2: add the hidden-state half of the split matmul, then ReLU.
    h2 = jnp.maximum(
        jnp.dot(h1, w2h_ref[...], preferred_element_type=jnp.float32)
        + g[:, h1p:],
        0.0,
    ).astype(w3_ref.dtype)

    # fc3 as a contraction over the last axes -> lane-dense (1, TB) row,
    # no explicit h2.T (no XLU transpose pass). Scalar bias added in wrapper.
    q = lax.dot_general(
        w3_ref[...], h2,
        dimension_numbers=(((1,), (1,)), ((), ())),
        preferred_element_type=jnp.float32,
    )
    o_ref[...] = q.astype(o_ref.dtype)


def critic_forward(x, a, kparams, *, tile_b=2048, split_for_two_cores=True):
    """Critic forward pass. `kparams` comes from pack_critic_params()."""
    B = x.shape[0]

    wcat = kparams["wcat"]          # (S + A + 1, H1p + H2p), compute dtype
    w2h = kparams["w2h"]            # (H1p, H2p)
    w3r = kparams["w3r"]            # (1, H2p)
    dt = wcat.dtype
    kin = wcat.shape[0]
    h1p, h2p = w2h.shape

    # Batch tile: multiple of 128, capped at tile_b (large to amortize per-step
    # overhead). If the whole batch fits in one tile but B > 128, split in two
    # so the "parallel" axis can shard across v7x's two TensorCores.
    TB = _round_up(min(tile_b, max(B, 1)), 128)
    B_pad = _round_up(B, TB)
    if split_for_two_cores and B > 128 and B_pad // TB == 1:
        TB = _round_up((B + 1) // 2, 128)
        B_pad = _round_up(B, TB)
    nt = B_pad // TB

    # Single wrapper-side preprocessing op: concat [x, a, 1], cast to the
    # compute dtype and pad the batch (XLA fuses concat+convert+pad into one
    # pass over the ~ (S+A+1) bytes/row input).
    ones = jnp.ones((B, 1), x.dtype)
    xa = jnp.concatenate([x, a, ones], axis=1).astype(dt)
    if B_pad != B:
        xa = jnp.pad(xa, ((0, B_pad - B), (0, 0)))

    out = pl.pallas_call(
        _critic_kernel,
        out_shape=jax.ShapeDtypeStruct((1, B_pad), jnp.float32),
        grid_spec=pltpu.PrefetchScalarGridSpec(
            num_scalar_prefetch=0,
            grid=(nt,),
            in_specs=[
                pl.BlockSpec((TB, kin), lambda i: (i, 0)),        # xa (streamed)
                pl.BlockSpec((kin, h1p + h2p), lambda i: (0, 0)),  # packed [W1|b1 ; W2a|b2]
                pl.BlockSpec((h1p, h2p), lambda i: (0, 0)),        # W2[:hidden1]
                pl.BlockSpec((1, h2p), lambda i: (0, 0)),          # W3 as a row
            ],
            out_specs=pl.BlockSpec((1, TB), lambda i: (0, i)),     # lane-dense q row
        ),
        compiler_params=pltpu.CompilerParams(
            dimension_semantics=("parallel",)),
    )(xa, wcat, w2h, w3r)

    # Fold the scalar fc3 bias and restore the module's (B, 1) layout.
    q = out[0, :B][:, None] + kparams["b3"]
    return q


def make_critic_params(key, num_states, num_actions, latent_factor=2,
                       init_w=0.003):
    """Logical (unpadded) parameters mirroring the PyTorch Critic.

    fc1/fc2 weights: fanin_init (uniform +/- 1/sqrt(fan_in)); fc3 weight:
    uniform(-init_w, init_w); biases: PyTorch nn.Linear default
    (uniform +/- 1/sqrt(fan_in)). Weights stored as (in, out): forward is
    x @ W + b.
    """
    hidden1 = num_states * latent_factor * 4
    hidden2 = num_states * latent_factor * 3
    in2 = hidden1 + num_actions

    ks = jax.random.split(key, 6)

    def u(k, shape, bound):
        return jax.random.uniform(k, shape, jnp.float32, -bound, bound)

    bound1 = 1.0 / float(num_states) ** 0.5
    bound2 = 1.0 / float(in2) ** 0.5
    bound3 = 1.0 / float(hidden2) ** 0.5

    return {
        "w1": u(ks[0], (num_states, hidden1), bound1),
        "b1": u(ks[1], (1, hidden1), bound1),
        "w2": u(ks[2], (in2, hidden2), bound2),
        "b2": u(ks[3], (1, hidden2), bound2),
        "w3": u(ks[4], (hidden2, 1), init_w),
        "b3": u(ks[5], (1, 1), bound3),
    }


def pack_critic_params(params, compute_dtype=jnp.bfloat16):
    """Kernel layout.

    Builds the packed block-diagonal weight
        Wcat = [[W1, 0], [0, W2[hidden1:]], [b1, b2]]   (S + A + 1, H1p + H2p)
    so that [x | a | 1] @ Wcat = [x@W1 + b1 | a@W2a + b2], plus the
    zero-padded W2[:hidden1] block and the fc3 weight as a row. hidden1 and
    hidden2 are zero-padded to multiples of 128 lanes (padded columns carry
    zero weight and zero bias, so they contribute nothing to q).
    """
    w1, b1, w2, b2, w3, b3 = (params["w1"], params["b1"], params["w2"],
                              params["b2"], params["w3"], params["b3"])
    S, H1 = w1.shape
    in2, H2 = w2.shape
    A = in2 - H1
    H1p = _round_up(H1, 128)
    H2p = _round_up(H2, 128)

    wcat = jnp.zeros((S + A + 1, H1p + H2p), jnp.float32)
    wcat = wcat.at[:S, :H1].set(w1)                       # fc1 weight block
    wcat = wcat.at[S:S + A, H1p:H1p + H2].set(w2[H1:, :])  # fc2 action block
    wcat = wcat.at[S + A, :H1].set(b1[0])                  # fc1 bias row
    wcat = wcat.at[S + A, H1p:H1p + H2].set(b2[0])         # fc2 bias row

    w2h = jnp.zeros((H1p, H2p), jnp.float32)
    w2h = w2h.at[:H1, :H2].set(w2[:H1, :])                  # fc2 hidden block

    w3r = jnp.zeros((1, H2p), jnp.float32)
    w3r = w3r.at[:, :H2].set(w3.T)                          # fc3 as a row

    return {
        "wcat": wcat.astype(compute_dtype),
        "w2h": w2h.astype(compute_dtype),
        "w3r": w3r.astype(compute_dtype),
        "b3": b3.astype(jnp.float32),   # scalar, folded in the wrapper (f32)
    }


def critic_ref(x, a, params):
    """Pure-JAX reference mirroring the PyTorch module (unpadded params)."""
    h1 = jnp.maximum(x @ params["w1"] + params["b1"], 0.0)
    cat = jnp.concatenate([h1, a], axis=1)
    h2 = jnp.maximum(cat @ params["w2"] + params["b2"], 0.0)
    return h2 @ params["w3"] + params["b3"]


if __name__ == "__main__":
    num_states, num_actions, batch = 16, 4, 8

    key = jax.random.PRNGKey(0)
    kp, kx, ka = jax.random.split(key, 3)

    params = make_critic_params(kp, num_states, num_actions)

    x = jax.random.normal(kx, (batch, num_states), jnp.float32)
    a = jax.random.normal(ka, (batch, num_actions), jnp.float32)
    q_ref = critic_ref(x, a, params)

    # f32-operand path: exactness check (single grid step, padded batch tile).
    kparams_f32 = pack_critic_params(params, compute_dtype=jnp.float32)
    q = jax.block_until_ready(critic_forward(x, a, kparams_f32))
    assert q.shape == (batch, 1)
    assert jnp.allclose(q, q_ref, atol=1e-5, rtol=1e-5)

    # Multi-tile f32 check (exercises the batch grid, the two-core tile split
    # and the remainder padding: B=700 -> TB=384, 2 grid steps).
    big = 700
    kx2, ka2 = jax.random.split(jax.random.PRNGKey(1), 2)
    xb = jax.random.normal(kx2, (big, num_states), jnp.float32)
    ab = jax.random.normal(ka2, (big, num_actions), jnp.float32)
    qb = jax.block_until_ready(critic_forward(xb, ab, kparams_f32))
    qb_ref = critic_ref(xb, ab, params)
    assert qb.shape == (big, 1)
    assert jnp.allclose(qb, qb_ref, atol=1e-4, rtol=1e-4)

    # Default bf16-operand path (f32 accumulation/epilogue): accuracy check
    # against the f32 reference — expected error is O(1e-4) here, tolerance
    # kept generous for robustness.
    kparams_bf16 = pack_critic_params(params)  # bf16 default
    qb_bf16 = jax.block_until_ready(critic_forward(xb, ab, kparams_bf16))
    assert qb_bf16.shape == (big, 1)
    assert bool(jnp.all(jnp.isfinite(qb_bf16)))
    assert jnp.allclose(qb_bf16, qb_ref, atol=1e-2, rtol=1e-2)

    print("KERNEL_OK")
</pallas_src>

<mosaic_0001>
module attributes {stable_mosaic.version = 11 : i64} {
  func.func @_critic_kernel(%arg0: i32, %arg1: memref<128x21xf32, #tpu.memory_space<vmem>>, %arg2: memref<21x256xf32, #tpu.memory_space<vmem>>, %arg3: memref<128x128xf32, #tpu.memory_space<vmem>>, %arg4: memref<1x128xf32, #tpu.memory_space<vmem>>, %arg5: memref<1x128xf32, #tpu.memory_space<vmem>>) attributes {dimension_semantics = [#tpu.dimension_semantics<parallel>], iteration_bounds = array<i64: 1>, scalar_prefetch = 0 : i64, scratch_operands = 0 : i64, tpu.core_type = #tpu.core_type<tc>, window_params = [{transform_indices = @transform_0, window_bounds = array<i64: 128, 21>}, {pipeline_mode = #tpu.pipeline_mode<synchronous>, transform_indices = @transform_1, window_bounds = array<i64: 21, 256>}, {pipeline_mode = #tpu.pipeline_mode<synchronous>, transform_indices = @transform_2, window_bounds = array<i64: 128, 128>}, {pipeline_mode = #tpu.pipeline_mode<synchronous>, transform_indices = @transform_3, window_bounds = array<i64: 1, 128>}, {transform_indices = @transform_4, window_bounds = array<i64: 1, 128>}]} {
    %c0 = arith.constant 0 : index
    %c0_0 = arith.constant 0 : index
    %0 = vector.load %arg1[%c0, %c0_0] : memref<128x21xf32, #tpu.memory_space<vmem>>, vector<128x21xf32>
    %c0_1 = arith.constant 0 : index
    %c0_2 = arith.constant 0 : index
    %1 = vector.load %arg2[%c0_1, %c0_2] : memref<21x256xf32, #tpu.memory_space<vmem>>, vector<21x256xf32>
    %cst = arith.constant dense<0.000000e+00> : vector<128x256xf32>
    %2 = tpu.matmul %0, %1, %cst {dimension_numbers = #tpu.dot_dimension_numbers<[1], [0], [0], [1], [0, 0, 1, 1], [], []>} : vector<128x21xf32>, vector<21x256xf32>, vector<128x256xf32> -> vector<128x256xf32>
    %3 = vector.extract_strided_slice %2 {offsets = [0, 0], sizes = [128, 128], strides = [1, 1]} : vector<128x256xf32> to vector<128x128xf32>
    %cst_3 = arith.constant 0.000000e+00 : f32
    %4 = vector.broadcast %cst_3 : f32 to vector<128x128xf32>
    %5 = arith.maximumf %3, %4 : vector<128x128xf32>
    %c0_4 = arith.constant 0 : index
    %c0_5 = arith.constant 0 : index
    %6 = vector.load %arg3[%c0_4, %c0_5] : memref<128x128xf32, #tpu.memory_space<vmem>>, vector<128x128xf32>
    %cst_6 = arith.constant dense<0.000000e+00> : vector<128x128xf32>
    %7 = tpu.matmul %5, %6, %cst_6 {dimension_numbers = #tpu.dot_dimension_numbers<[1], [0], [0], [1], [0, 0, 1, 1], [], []>} : vector<128x128xf32>, vector<128x128xf32>, vector<128x128xf32> -> vector<128x128xf32>
    %8 = vector.extract_strided_slice %2 {offsets = [0, 128], sizes = [128, 128], strides = [1, 1]} : vector<128x256xf32> to vector<128x128xf32>
    %9 = arith.addf %7, %8 : vector<128x128xf32>
    %cst_7 = arith.constant 0.000000e+00 : f32
    %10 = vector.broadcast %cst_7 : f32 to vector<128x128xf32>
    %11 = arith.maximumf %9, %10 : vector<128x128xf32>
    %c0_8 = arith.constant 0 : index
    %c0_9 = arith.constant 0 : index
    %12 = vector.load %arg4[%c0_8, %c0_9] : memref<1x128xf32, #tpu.memory_space<vmem>>, vector<1x128xf32>
    %cst_10 = arith.constant dense<0.000000e+00> : vector<1x128xf32>
    %13 = tpu.matmul %12, %11, %cst_10 {dimension_numbers = #tpu.dot_dimension_numbers<[1], [1], [0], [0], [0, 0, 1, 0], [], []>} : vector<1x128xf32>, vector<128x128xf32>, vector<1x128xf32> -> vector<1x128xf32>
    %c0_11 = arith.constant 0 : index
    %c0_12 = arith.constant 0 : index
    %14 = vector.load %arg5[%c0_11, %c0_12] : memref<1x128xf32, #tpu.memory_space<vmem>>, vector<1x128xf32>
    tpu.vector_store %arg5[%c0_11, %c0_12], %13 {strides = array<i32>} : memref<1x128xf32, #tpu.memory_space<vmem>>, vector<1x128xf32>,
    return
  }
  func.func @transform_0(%arg0: i32) -> (i32, i32) {
    %c0_i32 = arith.constant 0 : i32
    %c0_i32_0 = arith.constant 0 : i32
    return %arg0, %c0_i32 : i32, i32
  }
  func.func @transform_1(%arg0: i32) -> (i32, i32) {
    %c0_i32 = arith.constant 0 : i32
    %c0_i32_0 = arith.constant 0 : i32
    %c0_i32_1 = arith.constant 0 : i32
    return %c0_i32, %c0_i32_0 : i32, i32
  }
  func.func @transform_2(%arg0: i32) -> (i32, i32) {
    %c0_i32 = arith.constant 0 : i32
    %c0_i32_0 = arith.constant 0 : i32
    %c0_i32_1 = arith.constant 0 : i32
    return %c0_i32, %c0_i32_0 : i32, i32
  }
  func.func @transform_3(%arg0: i32) -> (i32, i32) {
    %c0_i32 = arith.constant 0 : i32
    %c0_i32_0 = arith.constant 0 : i32
    %c0_i32_1 = arith.constant 0 : i32
    return %c0_i32, %c0_i32_0 : i32, i32
  }
  func.func @transform_4(%arg0: i32) -> (i32, i32) {
    %c0_i32 = arith.constant 0 : i32
    %c0_i32_0 = arith.constant 0 : i32
    return %c0_i32, %arg0 : i32, i32
  }
}

</mosaic_0001>

<bundles_post_ra>
// kernel: tpu_custom_call.1
= control target key start
LH: loop header
LB: loop body
LE: loop exit
PB: predicated region body
PF: predicated region fallthrough
CT: control target
= control target key end

     0   :  { %9 = vsyncpa [#allocation3], 0  ;;  %s1068_s0 = inlined_call_operand.vmem [shape: f32[128,21], index: 0, kind: input, shape index: {}]   ;;  %s1069_s1 = inlined_call_operand.hbm [shape: f32[21,256], index: 1, kind: input, shape index: {}]   ;;  %s1070_s2 = inlined_call_operand.vmem [shape: f32[128,128], index: 2, kind: input, shape index: {}]   ;;  %s1071_s3 = inlined_call_operand.vmem [shape: f32[1,128], index: 3, kind: input, shape index: {}]   ;;  %s1072_s4 = inlined_call_operand.hbm [shape: f32[1,128], index: 4, kind: output, shape index: {}]  }
   0x1   :  { %10 = vsyncpa [#allocation4], 0  ;;  %s824_s15 = smov [#allocation2]   ;;  %s776_s19 = scalar_lea.hbm %s1069_s1, 768 }
   0x2   :  { %s18_s16 = sshll.u32 %s824_s15, 4  ;;  %p777_p0 = scmp.ne.s32.totalorder %s1069_s1, %s776_s19  ;;  %s19_s16 = int_to_ptr.vmem [resolvable:$true] %s18_s16 }
   0x3   :  { %p780_p1 = scmp.lt.u32.totalorder %s776_s19, %s1069_s1 }
   0x5   :  { %p782_p2 = pnand %p780_p1, %p777_p0 }
   0x7   :  { %785 = shalt.err (!%p782_p2)
}
   0x8   :  { %s786_s24 = scalar_lea.vmem %s19_s16, 768  ;;  %p791_p4 = scmp.lt.s32.totalorder %s19_s16, %s19_s16 }
   0x9   :  { %p787_p3 = scmp.ne.s32.totalorder %s19_s16, %s786_s24  ;;  %p792_p5 = scmp.lt.s32.totalorder %s786_s24, %s786_s24 }
   0xb   :  { %p793_p6 = por %p792_p5, %p791_p4 }
   0xd   :  { %p794_p7 = pnand %p793_p6, %p787_p3 }
   0xf   :  { %797 = shalt.err (!%p794_p7)
}
  0x10   :  { %s825_s25 = smov 256   ;;  %s826_s26 = smov 16  }
  0x11   :  { %24 = dma.hbm_to_vmem [thread:$0]  %s1069_s1, 768, %s19_s16, [#allocation3], %s825_s25, %s825_s25, %s826_s26  }
  0x12   :  { %820 = dma.done.wait [#allocation3], 768  }
  0x13   :  { %821 = vsyncadd [#allocation3], 4294966528  ;;  %v827_v0 = vmov 0.0   ;;  %v49_v1 = vld [vmem:[#allocation2 + $0x8] sm:$0xff]  ;;  %v51_v2 = vld [vmem:[#allocation2 + $0x18] sm:$0xff]  ;;  %vm103_vm0 = vcmask 1044480  }
  0x14   :  { %174 = vmatprep.mubr.f32.mxu0 %v827_v0  ;;  %v48_v3 = vld [vmem:[#allocation2] sm:$0xff]  ;;  %v709_v4 = vpack.c.bf16 %v51_v2, %v49_v1  ;;  %v50_v5 = vld [vmem:[#allocation2 + $0x10] sm:$0xff]  ;;  %v53_v7 = vld [vmem:[#allocation2 + $0x28] sm:$0x1f]  ;;  %vm54_vm1 = vcmask 171008   ;;  %vm829_vm2 = vmmov 0  }
  0x15   :  { %v711_v6 = vpack.c.bf16 %v50_v5, %v48_v3  ;;  %v52_v8 = vld [vmem:[#allocation2 + $0x20] sm:$0x1f]  ;;  %v288_v11 = vld [vmem:[%s1070_s2 + $0x8] sm:$0xff]  ;;  %v289_v13 = vld [vmem:[%s1070_s2 + $0x10] sm:$0xff]  ;;  %s830_s12 = smov [#allocation5]  }
  0x16   :  { %710 = vmatprep.subr.bf16.mxu0 %v709_v4  ;;  %v32_v9 = vld [vmem:[%s1068_s0] sm:$0xff]  ;;  %v290_v14 = vld [vmem:[%s1070_s2 + $0x18] sm:$0xff]  ;;  %v292_v17 = vld [vmem:[%s1070_s2 + $0x28] sm:$0xff]  ;;  %s542_s13 = sshll.u32 %s830_s12, 4  ;;  %s543_s13 = int_to_ptr.vmem [resolvable:$true] %s542_s13 }
  0x17   :  { %712 = vmatpush1.bf16.msra.mxu0 %v711_v6  ;;  %v287_v10 = vld [vmem:[%s1070_s2] sm:$0xff]  ;;  %v717_v15 = vpack.c.bf16 %v290_v14, %v289_v13  ;;  %v33_v18 = vld [vmem:[%s1068_s0 + $0x8] sm:$0xff]  ;;  %v293_v20 = vld [vmem:[%s1070_s2 + $0x30] sm:$0xff]  ;;  %s798_s14 = scalar_lea.vmem %s543_s13, 16  ;;  %s802_s15 = scalar_lea.vmem %s543_s13, 32 }
  0x18   :  { %551 = vmatprep.subr.msk.mxu0 %vm103_vm0, %v53_v7  ;;  %v713_v12 = vpack.c.bf16 %v288_v11, %v287_v10  ;;  %v291_v16 = vld [vmem:[%s1070_s2 + $0x20] sm:$0xff]  ;;  %v294_v21 = vld [vmem:[%s1070_s2 + $0x38] sm:$0xff]  ;;  %v34_v22 = vld [vmem:[%s1068_s0 + $0x10] sm:$0xff]  ;;  %p799_p8 = scmp.ne.s32.totalorder %s543_s13, %s798_s14  ;;  %p803_p9 = scmp.lt.s32.totalorder %s543_s13, %s543_s13 }
  0x19   :  { %v721_v19 = vpack.c.bf16 %v292_v17, %v291_v16  ;;  %v725_v23 = vpack.c.bf16 %v294_v21, %v293_v20  ;;  %v295_v24 = vld [vmem:[%s1070_s2 + $0x40] sm:$0xff]  ;;  %v296_v25 = vld [vmem:[%s1070_s2 + $0x48] sm:$0xff]  ;;  %v35_v26 = vld [vmem:[%s1068_s0 + $0x18] sm:$0xff]  ;;  %p804_p10 = scmp.lt.s32.totalorder %s802_s15, %s798_s14 }
  0x1a   :  { %714 = vmatprep.subr.bf16.mxu1 %v713_v12  ;;  %v729_v27 = vpack.c.bf16 %v296_v25, %v295_v24  ;;  %v297_v28 = vld [vmem:[%s1070_s2 + $0x50] sm:$0xff]  ;;  %v298_v29 = vld [vmem:[%s1070_s2 + $0x58] sm:$0xff]  ;;  %v36_v30 = vld [vmem:[%s1068_s0 + $0x20] sm:$0xff] }
  0x1b   :  { %552 = vmatpush1.msk.msra.mxu0 %vm103_vm0, %v52_v8  ;;  %716 = vmatpush3.bf16.msra.mxu1 %v713_v12  ;;  %v733_v31 = vpack.c.bf16 %v298_v29, %v297_v28  ;;  %v299_v32 = vld [vmem:[%s1070_s2 + $0x60] sm:$0xff]  ;;  %v300_v33 = vld [vmem:[%s1070_s2 + $0x68] sm:$0xff]  ;;  %v38_v36 = vld [vmem:[%s1068_s0 + $0x30] sm:$0xff]  ;;  %p805_p11 = por %p804_p10, %p803_p9 }
  0x1c   :  { %553 = vmatmul.mubr.msk.f32.vlgmr.msra.gmra.mrb[0].mxu0 %vm54_vm1, %v32_v9  ;;  %718 = vmatprep.subr.bf16.mxu1 %v717_v15  ;;  %v37_v34 = vld [vmem:[%s1068_s0 + $0x28] sm:$0xff]  ;;  %v737_v35 = vpack.c.bf16 %v300_v33, %v299_v32  ;;  %v39_v37 = vld [vmem:[%s1068_s0 + $0x38] sm:$0xff]  ;;  %v40_v38 = vld [vmem:[%s1068_s0 + $0x40] sm:$0xff] }
  0x1d   :  { %180 = vmatprep.mubr.f32.mxu0 %v827_v0  ;;  %v41_v39 = vld [vmem:[%s1068_s0 + $0x48] sm:$0xff]  ;;  %v42_v40 = vld [vmem:[%s1068_s0 + $0x50] sm:$0xff]  ;;  %v43_v41 = vld [vmem:[%s1068_s0 + $0x58] sm:$0xff]  ;;  %p806_p12 = pnand %p805_p11, %p799_p8 }
  0x1e   :  { %v44_v42 = vld [vmem:[%s1068_s0 + $0x60] sm:$0xff]  ;;  %v45_v43 = vld [vmem:[%s1068_s0 + $0x68] sm:$0xff]  ;;  %v46_v44 = vld [vmem:[%s1068_s0 + $0x70] sm:$0xff] }
  0x1f   :  { %720 = vmatpush3.bf16.msra.mxu1 %v717_v15  ;;  %v47_v45 = vld [vmem:[%s1068_s0 + $0x78] sm:$0xff]  ;;  %v301_v46 = vld [vmem:[%s1070_s2 + $0x70] sm:$0xff] }
  0x20   :  { %554 = vmatmul.mubr.msk.f32.gmra.mrb[2].mxu0 %vm54_vm1, %v33_v18  ;;  %722 = vmatprep.subr.bf16.mxu1 %v721_v19  ;;  %v302_v47 = vld [vmem:[%s1070_s2 + $0x78] sm:$0xff] }
  0x21   :  { %186 = vmatprep.mubr.f32.mxu0 %v827_v0  ;;  %v741_v48 = vpack.c.bf16 %v302_v47, %v301_v46 }
  0x23   :  { %724 = vmatpush3.bf16.msra.mxu1 %v721_v19 }
  0x24   :  { %555 = vmatmul.mubr.msk.f32.gmra.mrb[4].mxu0 %vm54_vm1, %v34_v22  ;;  %726 = vmatprep.subr.bf16.mxu1 %v725_v23 }
  0x25   :  { %192 = vmatprep.mubr.f32.mxu0 %v827_v0 }
  0x27   :  { %728 = vmatpush3.bf16.msra.mxu1 %v725_v23 }
  0x28   :  { %556 = vmatmul.mubr.msk.f32.gmra.mrb[6].mxu0 %vm54_vm1, %v35_v26  ;;  %730 = vmatprep.subr.bf16.mxu1 %v729_v27 }
  0x29   :  { %198 = vmatprep.mubr.f32.mxu0 %v827_v0 }
  0x2b   :  { %732 = vmatpush3.bf16.msra.mxu1 %v729_v27 }
  0x2c   :  { %557 = vmatmul.mubr.msk.f32.gmra.mrb[8].mxu0 %vm54_vm1, %v36_v30  ;;  %734 = vmatprep.subr.bf16.mxu1 %v733_v31 }
  0x2d   :  { %204 = vmatprep.mubr.f32.mxu0 %v827_v0 }
  0x2f   :  { %736 = vmatpush3.bf16.msra.mxu1 %v733_v31 }
  0x30   :  { %558 = vmatmul.mubr.msk.f32.gmra.mrb[10].mxu0 %vm54_vm1, %v37_v34  ;;  %738 = vmatprep.subr.bf16.mxu1 %v737_v35  ;;  %v828_v34 = vmov 0.0|0.0  }
  0x31   :  { %210 = vmatprep.mubr.f32.mxu0 %v827_v0  ;;  %745 = vmatprep.subr.bf16.mxu0 %v828_v34 }
  0x33   :  { %740 = vmatpush3.bf16.msra.mxu1 %v737_v35 }
  0x34   :  { %559 = vmatmul.mubr.msk.f32.gmra.mrb[12].mxu0 %vm54_vm1, %v38_v36  ;;  %742 = vmatprep.subr.bf16.mxu1 %v741_v48 }
  0x35   :  { %216 = vmatprep.mubr.f32.mxu0 %v827_v0 }
  0x37   :  { %744 = vmatpush3.bf16.msra.mxu1 %v741_v48 }
  0x38   :  { %560 = vmatmul.mubr.msk.f32.gmra.mrb[14].mxu0 %vm54_vm1, %v39_v37 }
  0x39   :  { %222 = vmatprep.mubr.f32.mxu0 %v827_v0 }
  0x3c   :  { %561 = vmatmul.mubr.msk.f32.gmra.mrb[16].mxu0 %vm54_vm1, %v40_v38 }
  0x3d   :  { %228 = vmatprep.mubr.f32.mxu0 %v827_v0 }
  0x40   :  { %562 = vmatmul.mubr.msk.f32.gmra.mrb[18].mxu0 %vm54_vm1, %v41_v39 }
  0x41   :  { %234 = vmatprep.mubr.f32.mxu0 %v827_v0 }
  0x44   :  { %563 = vmatmul.mubr.msk.f32.gmra.mrb[20].mxu0 %vm54_vm1, %v42_v40 }
  0x45   :  { %240 = vmatprep.mubr.f32.mxu0 %v827_v0 }
  0x48   :  { %564 = vmatmul.mubr.msk.f32.gmra.mrb[22].mxu0 %vm54_vm1, %v43_v41 }
  0x49   :  { %246 = vmatprep.mubr.f32.mxu0 %v827_v0 }
  0x4c   :  { %565 = vmatmul.mubr.msk.f32.gmra.mrb[24].mxu0 %vm54_vm1, %v44_v42 }
  0x4d   :  { %252 = vmatprep.mubr.f32.mxu0 %v827_v0 }
  0x50   :  { %566 = vmatmul.mubr.msk.f32.gmra.mrb[26].mxu0 %vm54_vm1, %v45_v43 }
  0x51   :  { %258 = vmatprep.mubr.f32.mxu0 %v827_v0 }
  0x54   :  { %567 = vmatmul.mubr.msk.f32.gmra.mrb[28].mxu0 %vm54_vm1, %v46_v44 }
  0x55   :  { %264 = vmatprep.mubr.f32.mxu0 %v827_v0 }
  0x58   :  { %568 = vmatmul.mubr.msk.f32.gmra.mrb[30].mxu0 %vm54_vm1, %v47_v45 }
  0x59   :  { %706 = vmatprep.mubr.msk.f32.mxu0 %vm829_vm2, %v827_v0 }
  0xef   :  { %v176_v49 = vpop.f32.mrb[0].mxu0 }
  0xf0   :  { %v996_v50 = vpop.f32.mrb[1].mxu0  ;;  %v271_v51 = vmax.f32 %v176_v49, 0.0 }
  0xf2   :  { %650 = vmatprep.mubr.f32.mxu1 %v271_v51 }
  0xf3   :  { %v182_v52 = vpop.f32.mrb[2].mxu0 }
  0xf4   :  { %v272_v53 = vmax.f32 %v182_v52, 0.0  ;;  %v998_v54 = vpop.f32.mrb[3].mxu0 }
  0xf6   :  { %651 = vmatmul.mubr.f32.vlgmr.msra.gmra.mrb[0].mxu1 %v272_v53 }
  0xf7   :  { %v188_v55 = vpop.f32.mrb[4].mxu0 }
  0xf8   :  { %v273_v56 = vmax.f32 %v188_v55, 0.0  ;;  %v1000_v57 = vpop.f32.mrb[5].mxu0 }
  0xfa   :  { %653 = vmatprep.mubr.f32.mxu1 %v273_v56 }
  0xfb   :  { %v194_v58 = vpop.f32.mrb[6].mxu0 }
  0xfc   :  { %v274_v59 = vmax.f32 %v194_v58, 0.0  ;;  %v1002_v60 = vpop.f32.mrb[7].mxu0 }
  0xfe   :  { %654 = vmatmul.mubr.f32.gmra.mrb[2].mxu1 %v274_v59 }
  0xff   :  { %v200_v61 = vpop.f32.mrb[8].mxu0 }
 0x100   :  { %v275_v62 = vmax.f32 %v200_v61, 0.0  ;;  %v1004_v63 = vpop.f32.mrb[9].mxu0 }
 0x102   :  { %656 = vmatprep.mubr.f32.mxu1 %v275_v62 }
 0x103   :  { %v206_v1 = vpop.f32.mrb[10].mxu0 }
 0x104   :  { %v276_v2 = vmax.f32 %v206_v1, 0.0  ;;  %v1006_v3 = vpop.f32.mrb[11].mxu0 }
 0x106   :  { %657 = vmatmul.mubr.f32.gmra.mrb[4].mxu1 %v276_v2 }
 0x107   :  { %v212_v4 = vpop.f32.mrb[12].mxu0 }
 0x108   :  { %v277_v5 = vmax.f32 %v212_v4, 0.0  ;;  %v1008_v6 = vpop.f32.mrb[13].mxu0 }
 0x10a   :  { %659 = vmatprep.mubr.f32.mxu1 %v277_v5 }
 0x10b   :  { %v218_v7 = vpop.f32.mrb[14].mxu0 }
 0x10c   :  { %v278_v8 = vmax.f32 %v218_v7, 0.0  ;;  %v1010_v9 = vpop.f32.mrb[15].mxu0 }
 0x10e   :  { %660 = vmatmul.mubr.f32.gmra.mrb[6].mxu1 %v278_v8 }
 0x10f   :  { %v224_v10 = vpop.f32.mrb[16].mxu0 }
 0x110   :  { %v279_v11 = vmax.f32 %v224_v10, 0.0  ;;  %v1012_v12 = vpop.f32.mrb[17].mxu0 }
 0x112   :  { %662 = vmatprep.mubr.f32.mxu1 %v279_v11 }
 0x113   :  { %v230_v13 = vpop.f32.mrb[18].mxu0 }
 0x114   :  { %v280_v14 = vmax.f32 %v230_v13, 0.0  ;;  %v1014_v15 = vpop.f32.mrb[19].mxu0 }
 0x116   :  { %663 = vmatmul.mubr.f32.gmra.mrb[8].mxu1 %v280_v14 }
 0x117   :  { %v236_v16 = vpop.f32.mrb[20].mxu0 }
 0x118   :  { %v281_v17 = vmax.f32 %v236_v16, 0.0  ;;  %v1016_v18 = vpop.f32.mrb[21].mxu0 }
 0x11a   :  { %665 = vmatprep.mubr.f32.mxu1 %v281_v17 }
 0x11b   :  { %v242_v19 = vpop.f32.mrb[22].mxu0 }
 0x11c   :  { %v282_v20 = vmax.f32 %v242_v19, 0.0  ;;  %v1018_v21 = vpop.f32.mrb[23].mxu0 }
 0x11e   :  { %666 = vmatmul.mubr.f32.gmra.mrb[10].mxu1 %v282_v20 }
 0x11f   :  { %v248_v22 = vpop.f32.mrb[24].mxu0 }
 0x120   :  { %v283_v23 = vmax.f32 %v248_v22, 0.0  ;;  %v1020_v24 = vpop.f32.mrb[25].mxu0 }
 0x122   :  { %668 = vmatprep.mubr.f32.mxu1 %v283_v23 }
 0x123   :  { %v254_v25 = vpop.f32.mrb[26].mxu0 }
 0x124   :  { %v284_v26 = vmax.f32 %v254_v25, 0.0  ;;  %v1022_v27 = vpop.f32.mrb[27].mxu0 }
 0x126   :  { %669 = vmatmul.mubr.f32.gmra.mrb[12].mxu1 %v284_v26 }
 0x127   :  { %v260_v28 = vpop.f32.mrb[28].mxu0 }
 0x128   :  { %v285_v29 = vmax.f32 %v260_v28, 0.0  ;;  %v1024_v30 = vpop.f32.mrb[29].mxu0 }
 0x12a   :  { %671 = vmatprep.mubr.f32.mxu1 %v285_v29 }
 0x12b   :  { %v266_v31 = vpop.f32.mrb[30].mxu0 }
 0x12c   :  { %v286_v32 = vmax.f32 %v266_v31, 0.0  ;;  %v1026_v33 = vpop.f32.mrb[31].mxu0 }
 0x12e   :  { %672 = vmatmul.mubr.f32.gmra.mrb[14].mxu1 %v286_v32 }
 0x1c9   :  { %v652_v35 = vpop.f32.mrb[0].mxu1 }
 0x1ca   :  { %v375_v36 = vadd.f32 %v652_v35, %v998_v54  ;;  %v369_v37 = vpop.f32.mrb[1].mxu1 }
 0x1cb   :  { %v370_v38 = vadd.f32 %v369_v37, %v996_v50 }
 0x1cc   :  { %v449_v39 = vmax.f32 %v375_v36, 0.0 }
 0x1cd   :  { %v448_v40 = vmax.f32 %v370_v38, 0.0 }
 0x1cf   :  { %v746_v41 = vpack.c.bf16 %v449_v39, %v448_v40 }
 0x1d1   :  { %v655_v42 = vpop.f32.mrb[2].mxu1  ;;  %747 = vmatpush3.bf16.xpose.msra.mxu0 %v746_v41 }
 0x1d2   :  { %v385_v43 = vadd.f32 %v655_v42, %v1002_v60  ;;  %v379_v44 = vpop.f32.mrb[3].mxu1  ;;  %748 = vmatprep.subr.bf16.mxu0 %v828_v34 }
 0x1d3   :  { %v380_v45 = vadd.f32 %v379_v44, %v1000_v57 }
 0x1d4   :  { %v451_v46 = vmax.f32 %v385_v43, 0.0 }
 0x1d5   :  { %v450_v0 = vmax.f32 %v380_v45, 0.0 }
 0x1d7   :  { %v749_v47 = vpack.c.bf16 %v451_v46, %v450_v0 }
 0x1d9   :  { %v658_v48 = vpop.f32.mrb[4].mxu1  ;;  %750 = vmatpush3.bf16.xpose.msra.mxu0 %v749_v47 }
 0x1da   :  { %v395_v49 = vadd.f32 %v658_v48, %v1006_v3  ;;  %v389_v50 = vpop.f32.mrb[5].mxu1  ;;  %751 = vmatprep.subr.bf16.mxu0 %v828_v34 }
 0x1db   :  { %v390_v51 = vadd.f32 %v389_v50, %v1004_v63 }
 0x1dc   :  { %v453_v52 = vmax.f32 %v395_v49, 0.0 }
 0x1dd   :  { %v452_v53 = vmax.f32 %v390_v51, 0.0 }
 0x1df   :  { %v752_v54 = vpack.c.bf16 %v453_v52, %v452_v53 }
 0x1e1   :  { %v661_v55 = vpop.f32.mrb[6].mxu1  ;;  %753 = vmatpush3.bf16.xpose.msra.mxu0 %v752_v54 }
 0x1e2   :  { %v405_v56 = vadd.f32 %v661_v55, %v1010_v9  ;;  %v399_v57 = vpop.f32.mrb[7].mxu1  ;;  %754 = vmatprep.subr.bf16.mxu0 %v828_v34 }
 0x1e3   :  { %v400_v58 = vadd.f32 %v399_v57, %v1008_v6 }
 0x1e4   :  { %v455_v59 = vmax.f32 %v405_v56, 0.0 }
 0x1e5   :  { %v454_v60 = vmax.f32 %v400_v58, 0.0 }
 0x1e7   :  { %v755_v61 = vpack.c.bf16 %v455_v59, %v454_v60 }
 0x1e9   :  { %v664_v62 = vpop.f32.mrb[8].mxu1  ;;  %756 = vmatpush3.bf16.xpose.msra.mxu0 %v755_v61 }
 0x1ea   :  { %v415_v1 = vadd.f32 %v664_v62, %v1014_v15  ;;  %v409_v63 = vpop.f32.mrb[9].mxu1  ;;  %757 = vmatprep.subr.bf16.mxu0 %v828_v34 }
 0x1eb   :  { %v410_v2 = vadd.f32 %v409_v63, %v1012_v12 }
 0x1ec   :  { %v457_v3 = vmax.f32 %v415_v1, 0.0 }
 0x1ed   :  { %v456_v4 = vmax.f32 %v410_v2, 0.0 }
 0x1ef   :  { %v758_v5 = vpack.c.bf16 %v457_v3, %v456_v4 }
 0x1f1   :  { %v667_v7 = vpop.f32.mrb[10].mxu1  ;;  %759 = vmatpush3.bf16.xpose.msra.mxu0 %v758_v5 }
 0x1f2   :  { %v425_v8 = vadd.f32 %v667_v7, %v1018_v21  ;;  %v419_v6 = vpop.f32.mrb[11].mxu1  ;;  %760 = vmatprep.subr.bf16.mxu0 %v828_v34 }
 0x1f3   :  { %v420_v9 = vadd.f32 %v419_v6, %v1016_v18 }
 0x1f4   :  { %v459_v10 = vmax.f32 %v425_v8, 0.0 }
 0x1f5   :  { %v458_v11 = vmax.f32 %v420_v9, 0.0 }
 0x1f7   :  { %v761_v13 = vpack.c.bf16 %v459_v10, %v458_v11 }
 0x1f9   :  { %v670_v14 = vpop.f32.mrb[12].mxu1  ;;  %762 = vmatpush3.bf16.xpose.msra.mxu0 %v761_v13 }
 0x1fa   :  { %v435_v15 = vadd.f32 %v670_v14, %v1022_v27  ;;  %v429_v12 = vpop.f32.mrb[13].mxu1  ;;  %763 = vmatprep.subr.bf16.mxu0 %v828_v34 }
 0x1fb   :  { %v430_v16 = vadd.f32 %v429_v12, %v1020_v24  ;;  %v464_v24 = vld [vmem:[%s1071_s3] sm:$0x1] }
 0x1fc   :  { %v461_v17 = vmax.f32 %v435_v15, 0.0 }
 0x1fd   :  { %v460_v19 = vmax.f32 %v430_v16, 0.0 }
 0x1ff   :  { %v764_v20 = vpack.c.bf16 %v461_v17, %v460_v19 }
 0x201   :  { %v673_v21 = vpop.f32.mrb[14].mxu1  ;;  %765 = vmatpush3.bf16.xpose.msra.mxu0 %v764_v20 }
 0x202   :  { %v445_v22 = vadd.f32 %v673_v21, %v1026_v33  ;;  %v439_v18 = vpop.f32.mrb[15].mxu1  ;;  %766 = vmatprep.subr.bf16.mxu0 %v828_v34 }
 0x203   :  { %v440_v23 = vadd.f32 %v439_v18, %v1024_v30 }
 0x204   :  { %v463_v25 = vmax.f32 %v445_v22, 0.0 }
 0x205   :  { %v462_v26 = vmax.f32 %v440_v23, 0.0 }
 0x207   :  { %v767_v27 = vpack.c.bf16 %v463_v25, %v462_v26 }
 0x209   :  { %768 = vmatpush3.bf16.xpose.msra.mxu0 %v767_v27 }
 0x210   :  { %707 = vmatmul.mubr.f32.vlgmr.msra.gmra.mrb[32].mxu0 %v464_v24 }
 0x2e3   :  { %v531_v28 = vpop.f32.mrb[32].mxu0 }
 0x2e4   :  { %535 = vst [vmem:[#allocation5] sm:$0x1] %v531_v28  ;;  %v708_v29 = vpop.f32.mrb[33].mxu0 }
 0x2e5   :  { %809 = shalt.err (!%p806_p12)
}
 0x2e6   :  { %s810_s18 = scalar_lea.hbm %s1072_s4, 16 }
 0x2e7   :  { %p811_p13 = scmp.ne.s32.totalorder %s1072_s4, %s810_s18  ;;  %p814_p0 = scmp.lt.u32.totalorder %s810_s18, %s1072_s4 }
 0x2e9   :  { %p816_p1 = pnand %p814_p0, %p811_p13 }
 0x2eb   :  { %819 = shalt.err (!%p816_p1)
}
 0x2ec   :  { %545 = dma.vmem_to_hbm [thread:$0]  %s543_s13, 16, %s1072_s4, [#allocation4]  }
 0x2ed   :  { %822 = dma.done.wait [#allocation4], 16  }
 0x2ee   :  { %823 = vsyncadd [#allocation4], 4294967280 }
 0x2ef   :  { %549 = vsyncpa [#allocation3], 1 }
 0x2f0   :  { %550 = vsyncpa [#allocation4], 1 }

</bundles_post_ra>
